<compile_context>
chip_gen: v5e
topology: v5e:2x2
jax: 0.10.0
libtpu: 0.0.40
codegen_flags: <defaults>
</compile_context>

<pallas_src>
import jax
import jax.numpy as jnp
from jax.experimental import pallas as pl
from jax.experimental.pallas import tpu as pltpu


def _round_up(n, m):
    return (n + m - 1) // m * m


def mlp_kernel(x_ref, w1_ref, b1_ref, w2_ref, b2_ref, o_ref):
    # fc1 on the MXU: [TB, D_in] @ [D_in, H] -> [TB, H], f32 accumulate.
    h = jnp.dot(x_ref[...], w1_ref[...], preferred_element_type=jnp.float32)
    # bias + ReLU on the VPU.
    h = jnp.maximum(h + b1_ref[...], 0.0)
    # fc2 (output width 1): VPU multiply + lane reduce instead of an N=1 MXU matmul.
    out = jnp.sum(h * w2_ref[...], axis=-1)            # [TB]
    # Lane-dense row: [1, TB] so the final store is an unmasked full-width vst.
    out = out.reshape(1, -1) + b2_ref[0, 0]
    o_ref[...] = jax.nn.sigmoid(out).astype(o_ref.dtype)


def mlp_forward(x, w1, b1, w2, b2, *, block_b=512):
    """x: [B, D_in], w1: [D_in, H], b1: [1, H], w2: [1, H] (torch fc2.weight), b2: [1, 1]."""
    B, d_in = x.shape
    h_dim = w1.shape[1]

    # Batch tile: multiple of 128 lanes (dense output row, (8,128)-friendly),
    # large enough to amortize ~0.35 us/grid-step, small enough for v7x's
    # 64 MiB VMEM with double-buffered input tiles.
    tb = min(block_b, _round_up(B, 128))
    b_pad = _round_up(B, tb)
    if b_pad != B:
        x = jnp.pad(x, ((0, b_pad - B), (0, 0)))
    num_tiles = b_pad // tb

    out_row = pl.pallas_call(
        mlp_kernel,
        out_shape=jax.ShapeDtypeStruct((1, b_pad), jnp.float32),
        grid=(num_tiles,),
        in_specs=[
            pl.BlockSpec((tb, d_in), lambda i: (i, 0)),          # x: tiled over batch
            pl.BlockSpec((d_in, h_dim), lambda i: (0, 0)),       # w1: resident in VMEM
            pl.BlockSpec((1, h_dim), lambda i: (0, 0)),          # b1: resident in VMEM
            pl.BlockSpec((1, h_dim), lambda i: (0, 0)),          # w2: resident in VMEM
            pl.BlockSpec(memory_space=pltpu.MemorySpace.SMEM),   # b2: scalar in SMEM
        ],
        out_specs=pl.BlockSpec((1, tb), lambda i: (0, i)),       # lane-dense output row
        compiler_params=pltpu.CompilerParams(
            dimension_semantics=("parallel",),                   # shard batch across cores
        ),
    )(x, w1, b1, w2, b2)

    # (1, B_pad) lane-dense row -> (B, 1) column, matching the PyTorch module.
    return out_row.reshape(b_pad, 1)[:B]


def init_params(key, input_size, hidden_size):
    """Deterministic init mimicking torch.nn.Linear (uniform(-1/sqrt(fan_in), +1/sqrt(fan_in)))."""
    k1, k2, k3, k4 = jax.random.split(key, 4)
    bound1 = 1.0 / jnp.sqrt(jnp.float32(input_size))
    bound2 = 1.0 / jnp.sqrt(jnp.float32(hidden_size))
    # fc1 weight stored pre-transposed: [D_in, H]
    w1 = jax.random.uniform(k1, (input_size, hidden_size), jnp.float32, -bound1, bound1)
    b1 = jax.random.uniform(k2, (1, hidden_size), jnp.float32, -bound1, bound1)
    # fc2 weight kept in torch layout: [1, H]
    w2 = jax.random.uniform(k3, (1, hidden_size), jnp.float32, -bound2, bound2)
    b2 = jax.random.uniform(k4, (1, 1), jnp.float32, -bound2, bound2)
    return w1, b1, w2, b2


if __name__ == "__main__":
    input_size = 16
    hidden_size = 32
    batch = 8

    key = jax.random.PRNGKey(0)
    kx, kp = jax.random.split(key)
    x = jax.random.normal(kx, (batch, input_size), jnp.float32)
    w1, b1, w2, b2 = init_params(kp, input_size, hidden_size)

    out = jax.block_until_ready(mlp_forward(x, w1, b1, w2, b2))

    # Reference in plain JAX (same math as the PyTorch forward).
    ref = jax.nn.sigmoid(jnp.maximum(x @ w1 + b1, 0.0) @ w2.T + b2)
    assert out.shape == (batch, 1)
    assert jnp.allclose(out, ref, atol=1e-5, rtol=1e-5)

    print("KERNEL_OK")
</pallas_src>

<mosaic_0001>
module attributes {stable_mosaic.version = 11 : i64} {
  func.func @mlp_kernel(%arg0: i32, %arg1: memref<128x16xf32, #tpu.memory_space<vmem>>, %arg2: memref<16x32xf32, #tpu.memory_space<vmem>>, %arg3: memref<1x32xf32, #tpu.memory_space<vmem>>, %arg4: memref<1x32xf32, #tpu.memory_space<vmem>>, %arg5: memref<1x1xf32, #tpu.memory_space<smem>>, %arg6: memref<1x128xf32, #tpu.memory_space<vmem>>) attributes {dimension_semantics = [#tpu.dimension_semantics<parallel>], iteration_bounds = array<i64: 1>, scalar_prefetch = 0 : i64, scratch_operands = 0 : i64, tpu.core_type = #tpu.core_type<tc>, window_params = [{transform_indices = @transform_0, window_bounds = array<i64: 128, 16>}, {pipeline_mode = #tpu.pipeline_mode<synchronous>, transform_indices = @transform_1, window_bounds = array<i64: 16, 32>}, {pipeline_mode = #tpu.pipeline_mode<synchronous>, transform_indices = @transform_2, window_bounds = array<i64: 1, 32>}, {pipeline_mode = #tpu.pipeline_mode<synchronous>, transform_indices = @transform_3, window_bounds = array<i64: 1, 32>}, {transform_indices = @transform_4, window_bounds = array<i64: 1, 1>}, {transform_indices = @transform_5, window_bounds = array<i64: 1, 128>}]} {
    %c0 = arith.constant 0 : index
    %c0_0 = arith.constant 0 : index
    %0 = vector.load %arg1[%c0, %c0_0] : memref<128x16xf32, #tpu.memory_space<vmem>>, vector<128x16xf32>
    %c0_1 = arith.constant 0 : index
    %c0_2 = arith.constant 0 : index
    %1 = vector.load %arg2[%c0_1, %c0_2] : memref<16x32xf32, #tpu.memory_space<vmem>>, vector<16x32xf32>
    %cst = arith.constant dense<0.000000e+00> : vector<128x32xf32>
    %2 = tpu.matmul %0, %1, %cst {dimension_numbers = #tpu.dot_dimension_numbers<[1], [0], [0], [1], [0, 0, 1, 1], [], []>} : vector<128x16xf32>, vector<16x32xf32>, vector<128x32xf32> -> vector<128x32xf32>
    %c0_3 = arith.constant 0 : index
    %c0_4 = arith.constant 0 : index
    %3 = vector.load %arg3[%c0_3, %c0_4] : memref<1x32xf32, #tpu.memory_space<vmem>>, vector<1x32xf32>
    %4 = vector.broadcast %3 : vector<1x32xf32> to vector<128x32xf32>
    %5 = arith.addf %2, %4 : vector<128x32xf32>
    %cst_5 = arith.constant 0.000000e+00 : f32
    %6 = vector.broadcast %cst_5 : f32 to vector<128x32xf32>
    %7 = arith.maximumf %5, %6 : vector<128x32xf32>
    %c0_6 = arith.constant 0 : index
    %c0_7 = arith.constant 0 : index
    %8 = vector.load %arg4[%c0_6, %c0_7] : memref<1x32xf32, #tpu.memory_space<vmem>>, vector<1x32xf32>
    %9 = vector.broadcast %8 : vector<1x32xf32> to vector<128x32xf32>
    %10 = arith.mulf %7, %9 : vector<128x32xf32>
    %cst_8 = arith.constant dense<0.000000e+00> : vector<128xf32>
    %11 = vector.multi_reduction <add>, %10, %cst_8 [1] : vector<128x32xf32> to vector<128xf32>
    %12 = vector.shape_cast %11 : vector<128xf32> to vector<1x128xf32>
    %c0_9 = arith.constant 0 : index
    %c0_10 = arith.constant 0 : index
    %13 = memref.load %arg5[%c0_9, %c0_10] : memref<1x1xf32, #tpu.memory_space<smem>>
    %14 = vector.broadcast %13 : f32 to vector<1x128xf32>
    %15 = arith.addf %12, %14 : vector<1x128xf32>
    %16 = arith.negf %15 : vector<1x128xf32>
    %17 = math.exp %16 : vector<1x128xf32>
    %cst_11 = arith.constant 1.000000e+00 : f32
    %18 = vector.broadcast %cst_11 : f32 to vector<1x128xf32>
    %19 = arith.addf %18, %17 : vector<1x128xf32>
    %20 = arith.divf %18, %19 : vector<1x128xf32>
    %c0_12 = arith.constant 0 : index
    %c0_13 = arith.constant 0 : index
    %21 = vector.load %arg6[%c0_12, %c0_13] : memref<1x128xf32, #tpu.memory_space<vmem>>, vector<1x128xf32>
    tpu.vector_store %arg6[%c0_12, %c0_13], %20 {strides = array<i32>} : memref<1x128xf32, #tpu.memory_space<vmem>>, vector<1x128xf32>,
    return
  }
  func.func @transform_0(%arg0: i32) -> (i32, i32) {
    %c0_i32 = arith.constant 0 : i32
    %c0_i32_0 = arith.constant 0 : i32
    return %arg0, %c0_i32 : i32, i32
  }
  func.func @transform_1(%arg0: i32) -> (i32, i32) {
    %c0_i32 = arith.constant 0 : i32
    %c0_i32_0 = arith.constant 0 : i32
    %c0_i32_1 = arith.constant 0 : i32
    return %c0_i32, %c0_i32_0 : i32, i32
  }
  func.func @transform_2(%arg0: i32) -> (i32, i32) {
    %c0_i32 = arith.constant 0 : i32
    %c0_i32_0 = arith.constant 0 : i32
    %c0_i32_1 = arith.constant 0 : i32
    return %c0_i32, %c0_i32_0 : i32, i32
  }
  func.func @transform_3(%arg0: i32) -> (i32, i32) {
    %c0_i32 = arith.constant 0 : i32
    %c0_i32_0 = arith.constant 0 : i32
    %c0_i32_1 = arith.constant 0 : i32
    return %c0_i32, %c0_i32_0 : i32, i32
  }
  func.func @transform_4(%arg0: i32) -> (i32, i32) {
    %c0_i32 = arith.constant 0 : i32
    %c0_i32_0 = arith.constant 0 : i32
    %c0_i32_1 = arith.constant 0 : i32
    return %c0_i32, %c0_i32_0 : i32, i32
  }
  func.func @transform_5(%arg0: i32) -> (i32, i32) {
    %c0_i32 = arith.constant 0 : i32
    %c0_i32_0 = arith.constant 0 : i32
    return %c0_i32, %arg0 : i32, i32
  }
}

</mosaic_0001>

<bundles_post_ra>
// kernel: tpu_custom_call.1
= control target key start
LH: loop header
LB: loop body
LE: loop exit
PB: predicated region body
PF: predicated region fallthrough
CT: control target
= control target key end

     0   :  { %vm44_vm0 = vcmask 130048   ;;  %s1491_s0 = inlined_call_operand.vmem [shape: f32[128,16], index: 0, kind: input, shape index: {}]   ;;  %s1492_s1 = inlined_call_operand.vmem [shape: f32[16,32], index: 1, kind: input, shape index: {}]   ;;  %s1493_s2 = inlined_call_operand.vmem [shape: f32[1,32], index: 2, kind: input, shape index: {}]   ;;  %s1494_s3 = inlined_call_operand.vmem [shape: f32[1,32], index: 3, kind: input, shape index: {}]   ;;  %s1495_s4 = inlined_call_operand.<no memory space> [shape: f32[1,1], index: 4, kind: input, shape index: {}]   ;;  %s1496_s5 = inlined_call_operand.hbm [shape: f32[1,128], index: 5, kind: output, shape index: {}]  }
   0x1   :  { %v39_v0 = vld [vmem:[%s1492_s1 + $0x8] sm:$0xff]  ;;  %v38_v1 = vld [vmem:[%s1492_s1] sm:$0xff] }
   0x2   :  { %107 = vmatpush.msra.mxu0 %v39_v0  ;;  %694 = vmatpush.msra.mxu1 %v39_v0  ;;  %v22_v2 = vld [vmem:[%s1491_s0] sm:$0xff] }
   0x3   :  { %695 = vmatpush.msra.mxu2 %v39_v0  ;;  %v26_v3 = vld [vmem:[%s1491_s0 + $0x20] sm:$0xff]  ;;  %696 = vmatpush.msra.mxu3 %v39_v0 }
   0x4   :  { %v30_v4 = vld [vmem:[%s1491_s0 + $0x40] sm:$0xff]  ;;  %108 = vmatpush.msra.mxu0 %v38_v1  ;;  %697 = vmatpush.msra.mxu1 %v38_v1 }
   0x5   :  { %698 = vmatpush.msra.mxu2 %v38_v1  ;;  %662 = vmatmul.msk.f32.vlgmr.msra.gmra.mxu0 %vm44_vm0, %v22_v2  ;;  %v34_v5 = vld [vmem:[%s1491_s0 + $0x60] sm:$0xff] }
   0x6   :  { %666 = vmatmul.msk.f32.vlgmr.msra.gmra.mxu1 %vm44_vm0, %v26_v3  ;;  %670 = vmatmul.msk.f32.vlgmr.msra.gmra.mxu2 %vm44_vm0, %v30_v4 }
   0x7   :  { %699 = vmatpush.msra.mxu3 %v38_v1 }
   0x8   :  { %674 = vmatmul.msk.f32.vlgmr.msra.gmra.mxu3 %vm44_vm0, %v34_v5 }
   0x9   :  { %11 = vsyncpa [#allocation4], 0  ;;  %v23_v6 = vld [vmem:[%s1491_s0 + $0x8] sm:$0xff]  ;;  %v24_v10 = vld [vmem:[%s1491_s0 + $0x10] sm:$0xff]  ;;  %vm194_vm1 = vcmask 261120   ;;  %vm586_vm14 = vcmask 130112  }
   0xa   :  { %v31_v7 = vld [vmem:[%s1491_s0 + $0x48] sm:$0xff]  ;;  %v32_v11 = vld [vmem:[%s1491_s0 + $0x50] sm:$0xff]  ;;  %v25_v14 = vld [vmem:[%s1491_s0 + $0x18] sm:$0xff]  ;;  %s653_s8 = sshll.u32 %s1496_s5, 4  ;;  %s654_s8 = int_to_ptr.hbm [resolvable:$true] %s653_s8 }
   0xb   :  { %v27_v8 = vld [vmem:[%s1491_s0 + $0x28] sm:$0xff]  ;;  %v28_v12 = vld [vmem:[%s1491_s0 + $0x30] sm:$0xff]  ;;  %v33_v15 = vld [vmem:[%s1491_s0 + $0x58] sm:$0xff] }
   0xc   :  { %v35_v9 = vld [vmem:[%s1491_s0 + $0x68] sm:$0xff]  ;;  %v36_v13 = vld [vmem:[%s1491_s0 + $0x70] sm:$0xff]  ;;  %v29_v16 = vld [vmem:[%s1491_s0 + $0x38] sm:$0xff] }
   0xd   :  { %663 = vmatmul.msk.f32.gmra.mxu0 %vm44_vm0, %v23_v6  ;;  %v37_v17 = vld [vmem:[%s1491_s0 + $0x78] sm:$0xff]  ;;  %v897_v18 = vld [vmem:[%s1493_s2] ss:$0 sm:$0xff] }
   0xe   :  { %671 = vmatmul.msk.f32.gmra.mxu2 %vm44_vm0, %v31_v7  ;;  %667 = vmatmul.msk.f32.gmra.mxu1 %vm44_vm0, %v27_v8  ;;  %v903_v22 = vld [vmem:[%s1494_s3] ss:$0 sm:$0xff]  ;;  %s793_s3 = smov [#allocation3]  }
  0x10   :  { %675 = vmatmul.msk.f32.gmra.mxu3 %vm44_vm0, %v35_v9 }
  0x15   :  { %664 = vmatmul.msk.f32.gmra.mxu0 %vm44_vm0, %v24_v10 }
  0x16   :  { %672 = vmatmul.msk.f32.gmra.mxu2 %vm44_vm0, %v32_v11  ;;  %668 = vmatmul.msk.f32.gmra.mxu1 %vm44_vm0, %v28_v12 }
  0x18   :  { %676 = vmatmul.msk.f32.gmra.mxu3 %vm44_vm0, %v36_v13 }
  0x1d   :  { %665 = vmatmul.msk.f32.gmra.mxu0 %vm44_vm0, %v25_v14 }
  0x1e   :  { %673 = vmatmul.msk.f32.gmra.mxu2 %vm44_vm0, %v33_v15  ;;  %669 = vmatmul.msk.f32.gmra.mxu1 %vm44_vm0, %v29_v16 }
  0x20   :  { %677 = vmatmul.msk.f32.gmra.mxu3 %vm44_vm0, %v37_v17 }
  0x82   :  { %v110_v19 = vpop.f32.mrf.mxu0 }
  0x83   :  { %v111_v20 = vadd.f32 %v897_v18, %v110_v19  ;;  %v122_v21 = vpop.f32.mrf.mxu1 }
  0x84   :  { %v123_v23 = vadd.f32 %v897_v18, %v122_v21 }
  0x85   :  { %v158_v24 = vmax.f32 %v111_v20, 0.0 }
  0x86   :  { %v162_v25 = vmax.f32 %v123_v23, 0.0 }
  0x87   :  { %v178_v26 = vmul.f32 %v903_v22, %v158_v24 }
  0x88   :  { %v182_v27 = vmul.f32 %v903_v22, %v162_v25 }
  0x89   :  { %v134_v28 = vpop.f32.mrf.mxu2  ;;  %v195_v29 = vsel %vm194_vm1, %v178_v26, 0.0 }
  0x8a   :  { %v135_v30 = vadd.f32 %v897_v18, %v134_v28  ;;  %v207_v31 = vsel %vm194_vm1, %v182_v27, 0.0  ;;  %v113_v32 = vpop.f32.mrf.mxu0  ;;  %196 = vadd.xlane.f32.xlu0 %v195_v29 }
  0x8b   :  { %208 = vadd.xlane.f32.xlu2 %v207_v31  ;;  %v114_v33 = vadd.f32 %v897_v18, %v113_v32  ;;  %v125_v34 = vpop.f32.mrf.mxu1  ;;  %v146_v35 = vpop.f32.mrf.mxu3 }
  0x8c   :  { %v166_v36 = vmax.f32 %v135_v30, 0.0  ;;  %v126_v37 = vadd.f32 %v897_v18, %v125_v34  ;;  %v147_v3 = vadd.f32 %v897_v18, %v146_v35 }
  0x8d   :  { %v159_v38 = vmax.f32 %v114_v33, 0.0 }
  0x8e   :  { %v186_v39 = vmul.f32 %v903_v22, %v166_v36  ;;  %v163_v41 = vmax.f32 %v126_v37, 0.0  ;;  %v170_v9 = vmax.f32 %v147_v3, 0.0 }
  0x8f   :  { %v179_v40 = vmul.f32 %v903_v22, %v159_v38  ;;  %v955_v38 = vstv %s1495_s4  ;;  %s651_s4 = sshll.u32 %s793_s3, 4  ;;  %s652_s4 = int_to_ptr.vmem [resolvable:$true] %s651_s4 }
  0x90   :  { %v219_v42 = vsel %vm194_vm1, %v186_v39, 0.0  ;;  %v183_v52 = vmul.f32 %v903_v22, %v163_v41  ;;  %v190_v19 = vmul.f32 %v903_v22, %v170_v9 }
  0x91   :  { %v137_v43 = vpop.f32.mrf.mxu2  ;;  %v198_v44 = vsel %vm194_vm1, %v179_v40, 0.0 }
  0x92   :  { %v138_v45 = vadd.f32 %v897_v18, %v137_v43  ;;  %v116_v46 = vpop.f32.mrf.mxu0  ;;  %199 = vadd.xlane.f32.xlu0 %v198_v44  ;;  %v210_v57 = vsel %vm194_vm1, %v183_v52, 0.0  ;;  %v231_v27 = vsel %vm194_vm1, %v190_v19, 0.0 }
  0x93   :  { %220 = vadd.xlane.f32.xlu2 %v219_v42  ;;  %v117_v47 = vadd.f32 %v897_v18, %v116_v46  ;;  %v128_v48 = vpop.f32.mrf.mxu1  ;;  %v149_v49 = vpop.f32.mrf.mxu3 }
  0x94   :  { %v167_v50 = vmax.f32 %v138_v45, 0.0  ;;  %v129_v51 = vadd.f32 %v897_v18, %v128_v48  ;;  %v150_v31 = vadd.f32 %v897_v18, %v149_v49 }
  0x95   :  { %v160_v53 = vmax.f32 %v117_v47, 0.0 }
  0x96   :  { %v187_v54 = vmul.f32 %v903_v22, %v167_v50  ;;  %v164_v55 = vmax.f32 %v129_v51, 0.0  ;;  %v171_v35 = vmax.f32 %v150_v31, 0.0 }
  0x97   :  { %v180_v56 = vmul.f32 %v903_v22, %v160_v53 }
  0x98   :  { %v222_v58 = vsel %vm194_vm1, %v187_v54, 0.0  ;;  %v184_v1 = vmul.f32 %v903_v22, %v164_v55  ;;  %v191_v36 = vmul.f32 %v903_v22, %v171_v35 }
  0x99   :  { %v140_v59 = vpop.f32.mrf.mxu2  ;;  %v201_v60 = vsel %vm194_vm1, %v180_v56, 0.0 }
  0x9a   :  { %v141_v61 = vadd.f32 %v897_v18, %v140_v59  ;;  %202 = vadd.xlane.f32.xlu1 %v201_v60  ;;  %223 = vadd.xlane.f32.xlu0 %v222_v58  ;;  %v119_v62 = vpop.f32.mrf.mxu0  ;;  %v213_v6 = vsel %vm194_vm1, %v184_v1, 0.0  ;;  %v234_v37 = vsel %vm194_vm1, %v191_v36, 0.0  ;;  %v581_v59 = vlaneseq }
  0x9b   :  { %211 = vadd.xlane.f32.xlu2 %v210_v57  ;;  %v120_v63 = vadd.f32 %v897_v18, %v119_v62  ;;  %v152_v0 = vpop.f32.mrf.mxu3  ;;  %v131_v8 = vpop.f32.mrf.mxu1 }
  0x9c   :  { %v168_v2 = vmax.f32 %v141_v61, 0.0  ;;  %v153_v12 = vadd.f32 %v897_v18, %v152_v0  ;;  %v132_v13 = vadd.f32 %v897_v18, %v131_v8 }
  0x9d   :  { %v161_v5 = vmax.f32 %v120_v63, 0.0 }
  0x9e   :  { %v188_v4 = vmul.f32 %v903_v22, %v168_v2  ;;  %v172_v20 = vmax.f32 %v153_v12, 0.0  ;;  %v165_v23 = vmax.f32 %v132_v13, 0.0 }
  0x9f   :  { %v181_v15 = vmul.f32 %v903_v22, %v161_v5  ;;  %v981_v5 = vand.u32 127, %v581_v59 }
  0xa0   :  { %v225_v7 = vsel %vm194_vm1, %v188_v4, 0.0  ;;  %v192_v28 = vmul.f32 %v903_v22, %v172_v20  ;;  %v185_v29 = vmul.f32 %v903_v22, %v165_v23 }
  0xa1   :  { %v143_v10 = vpop.f32.mrf.mxu2  ;;  %v204_v25 = vsel %vm194_vm1, %v181_v15, 0.0  ;;  %v987_v12 = vadd.s32 4294967264, %v981_v5 }
  0xa2   :  { %v144_v11 = vadd.f32 %v897_v18, %v143_v10  ;;  %226 = vadd.xlane.f32.xlu1 %v225_v7  ;;  %214 = vadd.xlane.f32.xlu0 %v213_v6  ;;  %v237_v32 = vsel %vm194_vm1, %v192_v28, 0.0  ;;  %v216_v33 = vsel %vm194_vm1, %v185_v29, 0.0 }
  0xa3   :  { %v155_v14 = vpop.f32.mrf.mxu3 }
  0xa4   :  { %v169_v16 = vmax.f32 %v144_v11, 0.0  ;;  %v156_v17 = vadd.f32 %v897_v18, %v155_v14 }
  0xa6   :  { %v189_v21 = vmul.f32 %v903_v22, %v169_v16  ;;  %v173_v24 = vmax.f32 %v156_v17, 0.0  ;;  %v994_v16 = vadd.s32 4294967232, %v981_v5  ;;  %v997_v17 = vadd.s32 4294967288, %v981_v5 }
  0xa8   :  { %v228_v26 = vsel %vm194_vm1, %v189_v21, 0.0  ;;  %v193_v30 = vmul.f32 %v903_v22, %v173_v24  ;;  %v1006_v24 = vadd.s32 4294967256, %v981_v5 }
  0xa9   :  { %229 = vadd.xlane.f32.xlu2 %v228_v26 }
  0xaa   :  { %205 = vadd.xlane.f32.xlu1 %v204_v25  ;;  %232 = vadd.xlane.f32.xlu0 %v231_v27  ;;  %v240_v34 = vsel %vm194_vm1, %v193_v30, 0.0 }
  0xb1   :  { %238 = vadd.xlane.f32.xlu2 %v237_v32 }
  0xb2   :  { %217 = vadd.xlane.f32.xlu1 %v216_v33  ;;  %241 = vadd.xlane.f32.xlu0 %v240_v34 }
  0xba   :  { %235 = vadd.xlane.f32.xlu1 %v234_v37 }
  0xfd   :  { %v197_v18 = vpop.xlane.xlu0 %196 }
  0xfe   :  { %v209_v39 = vpop.xlane.xlu2 %208  ;;  %v245_v40 = vadd.f32 %v955_v38, %v197_v18 }
  0xff   :  { %v249_v41 = vadd.f32 %v955_v38, %v209_v39 }
 0x100   :  { %v678_v42 = vmul.f32 -1.442695, %v245_v40 }
 0x101   :  { %v682_v43 = vmul.f32 -1.442695, %v249_v41 }
 0x102   :  { %703 = vpow2.f32 %v678_v42 }
 0x103   :  { %705 = vpow2.f32 %v682_v43 }
 0x105   :  { %v200_v44 = vpop.xlane.xlu0 %199 }
 0x106   :  { %v221_v22 = vpop.xlane.xlu2 %220  ;;  %v246_v45 = vadd.f32 %v955_v38, %v200_v44 }
 0x107   :  { %v253_v46 = vadd.f32 %v955_v38, %v221_v22 }
 0x108   :  { %v704_v47 = vpop.eup %703  ;;  %v679_v48 = vmul.f32 -1.442695, %v246_v45 }
 0x109   :  { %v706_v49 = vpop.eup %705  ;;  %v961_v50 = vadd.f32 1.0, %v704_v47  ;;  %v686_v51 = vmul.f32 -1.442695, %v253_v46 }
 0x10a   :  { %v963_v52 = vadd.f32 1.0, %v706_v49  ;;  %707 = vpow2.f32 %v679_v48 }
 0x10b   :  { %709 = vrcp.f32 %v961_v50  ;;  %v334_v20 = vand.u32 2147483647, %v961_v50  ;;  %v336_v21 = vand.u32 2147483648, %v961_v50  ;;  %vm330_vm5 = vweird.f32 %v961_v50 }
 0x10c   :  { %711 = vrcp.f32 %v963_v52  ;;  %v394_v27 = vand.u32 2147483647, %v963_v52  ;;  %v396_v28 = vand.u32 2147483648, %v963_v52  ;;  %vm390_vm3 = vweird.f32 %v963_v52 }
 0x10d   :  { %713 = vpow2.f32 %v686_v51  ;;  %v203_v53 = vpop.xlane.xlu1 %202  ;;  %v224_v54 = vpop.xlane.xlu0 %223  ;;  %vm1023_vm6 = vcmp.eq.f32.partialorder %v334_v20, 8.507059e+37  ;;  %v337_v37 = vor.u32 1.1754944e-38, %v336_v21 }
 0x10e   :  { %v212_v55 = vpop.xlane.xlu2 %211  ;;  %v247_v56 = vadd.f32 %v955_v38, %v203_v53  ;;  %v254_v61 = vadd.f32 %v955_v38, %v224_v54  ;;  %vm1029_vm7 = vcmp.eq.f32.partialorder %v394_v27, 8.507059e+37  ;;  %v397_v41 = vor.u32 1.1754944e-38, %v396_v28 }
 0x10f   :  { %v250_v57 = vadd.f32 %v955_v38, %v212_v55  ;;  %v1063_v54 = vadd.s32 4294967224, %v981_v5 }
 0x110   :  { %v708_v58 = vpop.eup %707  ;;  %v680_v60 = vmul.f32 -1.442695, %v247_v56  ;;  %v687_v7 = vmul.f32 -1.442695, %v254_v61 }
 0x111   :  { %v970_v62 = vpop.eup %709  ;;  %v972_v63 = vadd.f32 1.0, %v708_v58  ;;  %v683_v0 = vmul.f32 -1.442695, %v250_v57 }
 0x112   :  { %v974_v1 = vpop.eup %711  ;;  %v326_v2 = vmul.f32 %v970_v62, %v961_v50  ;;  %715 = vpow2.f32 %v680_v60  ;;  %vm331_vm2 = vweird.f32 %v970_v62 }
 0x113   :  { %v714_v3 = vpop.eup %713  ;;  %v386_v4 = vmul.f32 %v974_v1, %v963_v52  ;;  %717 = vrcp.f32 %v972_v63  ;;  %vm391_vm4 = vweird.f32 %v974_v1  ;;  %vm1035_vm8 = vmor %vm330_vm5, %vm331_vm2  ;;  %v349_v22 = vand.u32 2147483647, %v972_v63 }
 0x114   :  { %v983_v6 = vadd.f32 1.0, %v714_v3  ;;  %v327_v8 = vsub.f32 1.0, %v326_v2  ;;  %719 = vpow2.f32 %v683_v0  ;;  %vm1042_vm9 = vmor %vm390_vm3, %vm391_vm4  ;;  %v351_v45 = vand.u32 2147483648, %v972_v63 }
 0x115   :  { %v227_v9 = vpop.xlane.xlu1 %226  ;;  %v387_v10 = vsub.f32 1.0, %v386_v4  ;;  %v215_v18 = vpop.xlane.xlu0 %214  ;;  %v1058_v52 = vadd.s32 4294967280, %v981_v5  ;;  %vm345_vm10 = vweird.f32 %v972_v63  ;;  %vm1081_vm13 = vcmp.eq.f32.partialorder %v349_v22, 8.507059e+37 }
 0x116   :  { %721 = vrcp.f32 %v983_v6  ;;  %v255_v13 = vadd.f32 %v955_v38, %v227_v9  ;;  %v328_v15 = vmul.f32 %v970_v62, %v327_v8  ;;  %v456_v50 = vand.u32 2147483648, %v983_v6 }
 0x117   :  { %723 = vpow2.f32 %v687_v7  ;;  %v388_v26 = vmul.f32 %v974_v1, %v387_v10  ;;  %v251_v51 = vadd.f32 %v955_v38, %v215_v18  ;;  %vm450_vm12 = vweird.f32 %v983_v6 }
 0x118   :  { %v716_v11 = vpop.eup %715  ;;  %v688_v32 = vmul.f32 -1.442695, %v255_v13  ;;  %v329_v33 = vadd.f32 %v970_v62, %v328_v15  ;;  %v454_v61 = vand.u32 2147483647, %v983_v6  ;;  %v352_v3 = vor.u32 1.1754944e-38, %v351_v45 }
 0x119   :  { %v990_v14 = vpop.eup %717  ;;  %v999_v19 = vadd.f32 1.0, %v716_v11  ;;  %v389_v39 = vadd.f32 %v974_v1, %v388_v26  ;;  %v1098_v11 = vadd.s32 4294967248, %v981_v5 }
 0x11a   :  { %v341_v23 = vmul.f32 %v990_v14, %v972_v63  ;;  %v720_v25 = vpop.eup %719  ;;  %v333_v48 = vsel %vm1035_vm8, %v970_v62, %v329_v33  ;;  %vm346_vm11 = vweird.f32 %v990_v14  ;;  %v684_v62 = vmul.f32 -1.442695, %v251_v51 }
 0x11b   :  { %725 = vrcp.f32 %v999_v19  ;;  %v1015_v31 = vadd.f32 1.0, %v720_v25  ;;  %v393_v56 = vsel %vm1042_vm9, %v974_v1, %v389_v39  ;;  %v1076_v60 = vsel %vm1023_vm6, %v337_v37, %v333_v48  ;;  %vm1091_vm15 = vmor %vm345_vm10, %vm346_vm11 }
 0x11c   :  { %v1012_v29 = vpop.eup %721  ;;  %v342_v30 = vsub.f32 1.0, %v341_v23  ;;  %v230_v55 = vpop.xlane.xlu2 %229  ;;  %v457_v1 = vor.u32 1.1754944e-38, %v456_v50  ;;  %v1087_v7 = vsel %vm1029_vm7, %v397_v41, %v393_v56  ;;  %v583_v13 = vperm.slane %v1076_v60, %v981_v5 }
 0x11d   :  { %v446_v34 = vmul.f32 %v1012_v29, %v983_v6  ;;  %v724_v35 = vpop.eup %723  ;;  %727 = vrcp.f32 %v1015_v31  ;;  %v206_v58 = vpop.xlane.xlu1 %205  ;;  %vm1109_vm0 = vcmp.eq.f32.partialorder %v454_v61, 8.507059e+37  ;;  %v411_v23 = vand.u32 2147483648, %v1015_v31 }
 0x11e   :  { %v343_v43 = vmul.f32 %v990_v14, %v342_v30  ;;  %v1048_v46 = vadd.f32 1.0, %v724_v35  ;;  %729 = vpow2.f32 %v688_v32  ;;  %vm360_vm1 = vweird.f32 %v999_v19 }
 0x11f   :  { %v447_v49 = vsub.f32 1.0, %v446_v34  ;;  %v364_v25 = vand.u32 2147483647, %v999_v19  ;;  %v366_v26 = vand.u32 2147483648, %v999_v19  ;;  %v256_v27 = vadd.f32 %v955_v38, %v230_v55 }
 0x120   :  { %731 = vrcp.f32 %v1048_v46  ;;  %v344_v57 = vadd.f32 %v990_v14, %v343_v43  ;;  %vm451_vm2 = vweird.f32 %v1012_v29  ;;  %v597_v32 = vperm.slane %v1087_v7, %v987_v12 }
 0x121   :  { %v1050_v47 = vpop.eup %725  ;;  %v448_v0 = vmul.f32 %v1012_v29, %v447_v49  ;;  %733 = vpow2.f32 %v684_v62  ;;  %vm405_vm3 = vweird.f32 %v1015_v31  ;;  %v409_v36 = vand.u32 2147483647, %v1015_v31  ;;  %vm1132_vm4 = vmor %vm450_vm12, %vm451_vm2 }
 0x122   :  { %v356_v53 = vmul.f32 %v1050_v47, %v999_v19  ;;  %v348_v15 = vsel %vm1091_vm15, %v990_v14, %v344_v57  ;;  %v233_v14 = vpop.xlane.xlu0 %232  ;;  %v689_v18 = vmul.f32 -1.442695, %v256_v27  ;;  %v1136_v40 = vor.u32 1.1754944e-38, %v411_v23 }
 0x123   :  { %v1072_v59 = vpop.eup %727  ;;  %v449_v28 = vadd.f32 %v1012_v29, %v448_v0  ;;  %v353_v33 = vsel %vm1081_vm13, %v352_v3, %v348_v15  ;;  %vm361_vm5 = vweird.f32 %v1050_v47  ;;  %vm1139_vm6 = vcmp.eq.f32.partialorder %v364_v25, 8.507059e+37 }
 0x124   :  { %v730_v4 = vpop.eup %729  ;;  %v401_v9 = vmul.f32 %v1072_v59, %v1015_v31  ;;  %v357_v10 = vsub.f32 1.0, %v356_v53  ;;  %v367_v42 = vor.u32 1.1754944e-38, %v366_v26  ;;  %v469_v43 = vand.u32 2147483647, %v1048_v46  ;;  %v239_v44 = vpop.xlane.xlu2 %238  ;;  %vm1179_vm10 = vmor %vm360_vm1, %vm361_vm5 }
 0x125   :  { %v1105_v20 = vadd.f32 1.0, %v730_v4  ;;  %v453_v6 = vsel %vm1132_vm4, %v1012_v29, %v449_v28  ;;  %v585_v45 = vperm.slane %v353_v33, %v997_v17  ;;  %v248_v48 = vadd.f32 %v955_v38, %v206_v58  ;;  %v218_v49 = vpop.xlane.xlu1 %217 }
 0x126   :  { %v1107_v63 = vpop.eup %731  ;;  %v402_v34 = vsub.f32 1.0, %v401_v9  ;;  %v358_v35 = vmul.f32 %v1050_v47, %v357_v10  ;;  %v257_v55 = vadd.f32 %v955_v38, %v233_v14  ;;  %v471_v29 = vand.u32 2147483648, %v1048_v46 }
 0x127   :  { %v461_v30 = vmul.f32 %v1107_v63, %v1048_v46  ;;  %735 = vrcp.f32 %v1105_v20  ;;  %v734_v22 = vpop.eup %733  ;;  %v681_v60 = vmul.f32 -1.442695, %v248_v48  ;;  %v259_v17 = vadd.f32 %v955_v38, %v239_v44 }
 0x128   :  { %737 = vpow2.f32 %v689_v18  ;;  %v403_v50 = vmul.f32 %v1072_v59, %v402_v34  ;;  %v359_v51 = vadd.f32 %v1050_v47, %v358_v35  ;;  %v1151_v53 = vadd.f32 1.0, %v734_v22 }
 0x129   :  { %v462_v37 = vsub.f32 1.0, %v461_v30  ;;  %vm406_vm7 = vweird.f32 %v1072_v59  ;;  %vm1160_vm8 = vcmp.eq.f32.partialorder %v409_v36, 8.507059e+37  ;;  %vm465_vm9 = vweird.f32 %v1048_v46 }
 0x12a   :  { %739 = vrcp.f32 %v1151_v53  ;;  %v1170_v62 = vsel %vm1109_vm0, %v457_v1, %v453_v6  ;;  %v1173_v0 = vsel %vm586_vm14, %v585_v45, %v583_v13  ;;  %vm1183_vm11 = vcmp.eq.f32.partialorder %v469_v43, 8.507059e+37  ;;  %v242_v10 = vpop.xlane.xlu0 %241  ;;  %vm1202_vm14 = vmor %vm405_vm3, %vm406_vm7 }
 0x12b   :  { %v463_v57 = vmul.f32 %v1107_v63, %v462_v37  ;;  %741 = vpow2.f32 %v681_v60  ;;  %v404_v4 = vadd.f32 %v1072_v59, %v403_v50  ;;  %v363_v1 = vsel %vm1179_vm10, %v1050_v47, %v359_v51 }
 0x12c   :  { %v690_v8 = vmul.f32 -1.442695, %v257_v55  ;;  %v692_v9 = vmul.f32 -1.442695, %v259_v17  ;;  %vm590_vm12 = vcmask 195712   ;;  %vm466_vm13 = vweird.f32 %v1107_v63 }
 0x12d   :  { %v1154_v56 = vpop.eup %735  ;;  %v464_v19 = vadd.f32 %v1107_v63, %v463_v57  ;;  %v472_v15 = vor.u32 1.1754944e-38, %v471_v29  ;;  %v613_v23 = vperm.slane %v1170_v62, %v994_v16  ;;  %v252_v26 = vadd.f32 %v955_v38, %v218_v49  ;;  %vm1217_vm15 = vmor %vm465_vm9, %vm466_vm13  ;;  %v236_v18 = vpop.xlane.xlu1 %235 }
 0x12e   :  { %v476_v61 = vmul.f32 %v1154_v56, %v1105_v20  ;;  %v738_v13 = vpop.eup %737  ;;  %743 = vpow2.f32 %v690_v8  ;;  %v368_v27 = vsel %vm1139_vm6, %v367_v42, %v363_v1  ;;  %v484_v14 = vand.u32 2147483647, %v1105_v20 }
 0x12f   :  { %v1195_v25 = vadd.f32 1.0, %v738_v13  ;;  %745 = vpow2.f32 %v692_v9  ;;  %v260_v28 = vadd.f32 %v955_v38, %v242_v10  ;;  %v408_v33 = vsel %vm1202_vm14, %v1072_v59, %v404_v4 }
 0x130   :  { %v477_v21 = vsub.f32 1.0, %v476_v61  ;;  %v1210_v30 = vpop.eup %739  ;;  %vm480_vm0 = vweird.f32 %v1105_v20  ;;  %v1224_v34 = vadd.s32 4294967272, %v981_v5  ;;  %v468_v36 = vsel %vm1217_vm15, %v1107_v63, %v464_v19 }
 0x131   :  { %747 = vrcp.f32 %v1195_v25  ;;  %v742_v35 = vpop.eup %741  ;;  %v416_v46 = vmul.f32 %v1210_v30, %v1151_v53  ;;  %v685_v37 = vmul.f32 -1.442695, %v252_v26  ;;  %v589_v39 = vperm.slane %v368_v27, %v1058_v52 }
 0x132   :  { %v478_v59 = vmul.f32 %v1154_v56, %v477_v21  ;;  %v486_v41 = vand.u32 2147483648, %v1105_v20  ;;  %v1234_v42 = vadd.f32 1.0, %v742_v35  ;;  %v693_v43 = vmul.f32 -1.442695, %v260_v28 }
 0x133   :  { %v1239_v44 = vsel %vm1160_vm8, %v1136_v40, %v408_v33  ;;  %vm481_vm1 = vweird.f32 %v1154_v56  ;;  %vm1242_vm2 = vcmp.eq.f32.partialorder %v484_v14, 8.507059e+37  ;;  %v417_v22 = vsub.f32 1.0, %v416_v46 }
 0x134   :  { %749 = vpow2.f32 %v685_v37  ;;  %v744_v6 = vpop.eup %743  ;;  %v1248_v52 = vsel %vm1183_vm11, %v472_v15, %v468_v36  ;;  %v424_v45 = vand.u32 2147483647, %v1151_v53  ;;  %v258_v40 = vadd.f32 %v955_v38, %v236_v18  ;;  %vm1280_vm5 = vmor %vm480_vm0, %vm481_vm1 }
 0x135   :  { %751 = vrcp.f32 %v1234_v42  ;;  %v746_v48 = vpop.eup %745  ;;  %v479_v49 = vadd.f32 %v1154_v56, %v478_v59  ;;  %v418_v50 = vmul.f32 %v1210_v30, %v417_v22  ;;  %v1255_v51 = vadd.f32 1.0, %v744_v6 }
 0x136   :  { %753 = vpow2.f32 %v693_v43  ;;  %v487_v57 = vor.u32 1.1754944e-38, %v486_v41  ;;  %vm420_vm3 = vweird.f32 %v1151_v53  ;;  %v426_v29 = vand.u32 2147483648, %v1151_v53 }
 0x137   :  { %v1257_v55 = vpop.eup %747  ;;  %v1261_v60 = vadd.f32 1.0, %v746_v48  ;;  %v419_v17 = vadd.f32 %v1210_v30, %v418_v50  ;;  %vm421_vm4 = vweird.f32 %v1210_v30  ;;  %755 = vrcp.f32 %v1255_v51 }
 0x138   :  { %v491_v38 = vmul.f32 %v1257_v55, %v1195_v25  ;;  %v601_v58 = vperm.slane %v1239_v44, %v1006_v24  ;;  %v1272_v61 = vsel %vm590_vm12, %v589_v39, %v1173_v0  ;;  %v617_v2 = vperm.slane %v1248_v52, %v1063_v54  ;;  %vm1294_vm7 = vmor %vm420_vm3, %vm421_vm4 }
 0x139   :  { %757 = vrcp.f32 %v1261_v60  ;;  %v483_v1 = vsel %vm1280_vm5, %v1154_v56, %v479_v49  ;;  %vm1288_vm6 = vcmp.eq.f32.partialorder %v424_v45, 8.507059e+37  ;;  %v691_v9 = vmul.f32 -1.442695, %v258_v40 }
 0x13a   :  { %v750_v4 = vpop.eup %749  ;;  %v492_v8 = vsub.f32 1.0, %v491_v38  ;;  %v427_v13 = vor.u32 1.1754944e-38, %v426_v29  ;;  %v501_v19 = vand.u32 2147483648, %v1195_v25  ;;  %v1300_v15 = vadd.s32 4294967240, %v981_v5 }
 0x13b   :  { %v752_v10 = vpop.eup %751  ;;  %v1302_v56 = vadd.f32 1.0, %v750_v4  ;;  %v423_v26 = vsel %vm1294_vm7, %v1210_v30, %v419_v17  ;;  %vm495_vm8 = vweird.f32 %v1195_v25  ;;  %v499_v53 = vand.u32 2147483647, %v1195_v25 }
 0x13c   :  { %v754_v21 = vpop.eup %753  ;;  %v371_v47 = vmul.f32 %v752_v10, %v1234_v42  ;;  %v1312_v27 = vsel %vm1242_vm2, %v487_v57, %v483_v1  ;;  %vm594_vm9 = vcmask 261312   ;;  %v379_v14 = vand.u32 2147483647, %v1234_v42 }
 0x13d   :  { %v381_v28 = vand.u32 2147483648, %v1234_v42  ;;  %759 = vrcp.f32 %v1302_v56  ;;  %v1317_v33 = vpop.eup %755  ;;  %v493_v30 = vmul.f32 %v1257_v55, %v492_v8  ;;  %vm598_vm10 = vcmask 326912  }
 0x13e   :  { %v372_v31 = vsub.f32 1.0, %v371_v47  ;;  %v1320_v35 = vadd.f32 1.0, %v754_v21  ;;  %761 = vpow2.f32 %v691_v9  ;;  %v1326_v59 = vsel %vm1288_vm6, %v427_v13, %v423_v26 }
 0x13f   :  { %v1322_v36 = vpop.eup %757  ;;  %v502_v46 = vor.u32 1.1754944e-38, %v501_v19  ;;  %v506_v37 = vmul.f32 %v1317_v33, %v1255_v51  ;;  %v516_v18 = vand.u32 2147483648, %v1255_v51  ;;  %vm376_vm11 = vweird.f32 %v752_v10 }
 0x140   :  { %v373_v39 = vmul.f32 %v752_v10, %v372_v31  ;;  %v536_v41 = vmul.f32 %v1322_v36, %v1261_v60  ;;  %763 = vrcp.f32 %v1320_v35  ;;  %vm496_vm12 = vweird.f32 %v1257_v55 }
 0x141   :  { %vm1335_vm13 = vcmp.eq.f32.partialorder %v499_v53, 8.507059e+37  ;;  %vm375_vm14 = vweird.f32 %v1234_v42  ;;  %vm1340_vm15 = vcmp.eq.f32.partialorder %v379_v14, 8.507059e+37  ;;  %v382_v22 = vor.u32 1.1754944e-38, %v381_v28  ;;  %vm1360_vm5 = vmor %vm495_vm8, %vm496_vm12 }
 0x142   :  { %vm602_vm0 = vcmask 392512   ;;  %v494_v6 = vadd.f32 %v1257_v55, %v493_v30  ;;  %v374_v45 = vadd.f32 %v752_v10, %v373_v39  ;;  %v507_v40 = vsub.f32 1.0, %v506_v37  ;;  %vm377_vm1 = vmor %vm375_vm14, %vm376_vm11 }
 0x143   :  { %v514_v48 = vand.u32 2147483647, %v1255_v51  ;;  %v760_v49 = vpop.eup %759  ;;  %v605_v50 = vperm.slane %v1326_v59, %v1098_v11  ;;  %v1349_v57 = vor.u32 1.1754944e-38, %v516_v18  ;;  %v546_v42 = vand.u32 2147483648, %v1261_v60 }
 0x144   :  { %vm435_vm2 = vweird.f32 %v1302_v56  ;;  %v762_v29 = vpop.eup %761  ;;  %v378_v17 = vsel %vm377_vm1, %v752_v10, %v374_v45  ;;  %vm510_vm3 = vweird.f32 %v1255_v51  ;;  %v537_v38 = vsub.f32 1.0, %v536_v41 }
 0x145   :  { %v431_v3 = vmul.f32 %v760_v49, %v1302_v56  ;;  %v439_v4 = vand.u32 2147483647, %v1302_v56  ;;  %vm606_vm4 = vcmask 458112   ;;  %v383_v0 = vsel %vm1340_vm15, %v382_v22, %v378_v17 }
 0x146   :  { %vm511_vm6 = vweird.f32 %v1317_v33  ;;  %v441_v8 = vand.u32 2147483648, %v1302_v56  ;;  %v1368_v9 = vadd.f32 1.0, %v762_v29  ;;  %v1370_v10 = vpop.eup %763  ;;  %v498_v20 = vsel %vm1360_vm5, %v1257_v55, %v494_v6 }
 0x147   :  { %v593_v25 = vperm.slane %v383_v0, %v1224_v34  ;;  %v508_v13 = vmul.f32 %v1317_v33, %v507_v40  ;;  %v432_v19 = vsub.f32 1.0, %v431_v3  ;;  %v551_v21 = vmul.f32 %v1370_v10, %v1320_v35 }
 0x148   :  { %765 = vrcp.f32 %v1368_v9  ;;  %v544_v26 = vand.u32 2147483647, %v1261_v60  ;;  %v561_v53 = vand.u32 2147483648, %v1320_v35  ;;  %v538_v14 = vmul.f32 %v1322_v36, %v537_v38 }
 0x149   :  { %v595_v47 = vsel %vm594_vm9, %v593_v25, %v1272_v61  ;;  %vm540_vm7 = vweird.f32 %v1261_v60  ;;  %v433_v34 = vmul.f32 %v760_v49, %v432_v19  ;;  %vm436_vm8 = vweird.f32 %v760_v49 }
 0x14a   :  { %v599_v55 = vsel %vm598_vm10, %v597_v32, %v595_v47  ;;  %vm1390_vm11 = vcmp.eq.f32.partialorder %v439_v4, 8.507059e+37  ;;  %v442_v30 = vor.u32 1.1754944e-38, %v441_v8  ;;  %v552_v31 = vsub.f32 1.0, %v551_v21  ;;  %vm437_vm10 = vmor %vm435_vm2, %vm436_vm8 }
 0x14b   :  { %v509_v37 = vadd.f32 %v1317_v33, %v508_v13  ;;  %vm1395_vm9 = vcmp.eq.f32.partialorder %v514_v48, 8.507059e+37  ;;  %v434_v18 = vadd.f32 %v760_v49, %v433_v34  ;;  %v503_v39 = vsel %vm1335_vm13, %v502_v46, %v498_v20  ;;  %vm1420_vm13 = vmor %vm510_vm3, %vm511_vm6 }
 0x14c   :  { %v559_v12 = vand.u32 2147483647, %v1320_v35  ;;  %vm541_vm12 = vweird.f32 %v1322_v36  ;;  %v547_v7 = vor.u32 1.1754944e-38, %v546_v42  ;;  %v553_v32 = vmul.f32 %v1370_v10, %v552_v31 }
 0x14d   :  { %vm555_vm14 = vweird.f32 %v1320_v35  ;;  %v438_v41 = vsel %vm437_vm10, %v760_v49, %v434_v18  ;;  %v539_v63 = vadd.f32 %v1322_v36, %v538_v14  ;;  %vm1408_vm15 = vcmp.eq.f32.partialorder %v544_v26, 8.507059e+37 }
 0x14e   :  { %v562_v46 = vor.u32 1.1754944e-38, %v561_v53  ;;  %v603_v56 = vsel %vm602_vm0, %v601_v58, %v599_v55  ;;  %v766_v43 = vpop.eup %765  ;;  %v443_v45 = vsel %vm1390_vm11, %v442_v30, %v438_v41  ;;  %vm525_vm1 = vweird.f32 %v1368_v9  ;;  %vm1450_vm11 = vmor %vm540_vm7, %vm541_vm12 }
 0x14f   :  { %vm610_vm2 = vcmask 523712   ;;  %v620_v40 = vadd.s32 4294967216, %v981_v5  ;;  %v609_v24 = vperm.slane %v443_v45, %v1300_v15  ;;  %v521_v44 = vmul.f32 %v766_v43, %v1368_v9 }
 0x150   :  { %v513_v51 = vsel %vm1420_vm13, %v1317_v33, %v509_v37  ;;  %vm1433_vm0 = vcmp.eq.f32.partialorder %v559_v12, 8.507059e+37  ;;  %vm614_vm3 = vcmask 589312   ;;  %v554_v48 = vadd.f32 %v1370_v10, %v553_v32 }
 0x151   :  { %vm556_vm5 = vweird.f32 %v1370_v10  ;;  %v607_v15 = vsel %vm606_vm4, %v605_v50, %v603_v56  ;;  %vm618_vm6 = vcmask 654912   ;;  %v522_v49 = vsub.f32 1.0, %v521_v44 }
 0x152   :  { %v611_v42 = vsel %vm610_vm2, %v609_v24, %v607_v15  ;;  %vm622_vm8 = vcmask 720512   ;;  %v624_v33 = vadd.s32 4294967208, %v981_v5  ;;  %v529_v29 = vand.u32 2147483647, %v1368_v9  ;;  %vm1471_vm7 = vmor %vm555_vm14, %vm556_vm5 }
 0x153   :  { %v531_v17 = vand.u32 2147483648, %v1368_v9  ;;  %v615_v11 = vsel %vm614_vm3, %v613_v23, %v611_v42  ;;  %v621_v59 = vperm.slane %v1312_v27, %v620_v40  ;;  %v523_v50 = vmul.f32 %v766_v43, %v522_v49 }
 0x154   :  { %vm526_vm4 = vweird.f32 %v766_v43  ;;  %v543_v3 = vsel %vm1450_vm11, %v1322_v36, %v539_v63  ;;  %v619_v60 = vsel %vm618_vm6, %v617_v2, %v615_v11  ;;  %v518_v4 = vsel %vm1395_vm9, %v1349_v57, %v513_v51 }
 0x155   :  { %v623_v62 = vsel %vm622_vm8, %v621_v59, %v619_v60  ;;  %vm626_vm10 = vcmask 786112   ;;  %v628_v23 = vadd.s32 4294967200, %v981_v5  ;;  %v524_v27 = vadd.f32 %v766_v43, %v523_v50  ;;  %vm527_vm9 = vmor %vm525_vm1, %vm526_vm4 }
 0x156   :  { %v558_v54 = vsel %vm1471_vm7, %v1370_v10, %v554_v48  ;;  %v625_v52 = vperm.slane %v503_v39, %v624_v33  ;;  %v632_v2 = vadd.s32 4294967192, %v981_v5  ;;  %v532_v35 = vor.u32 1.1754944e-38, %v531_v17 }
 0x157   :  { %vm530_vm12 = vcmp.eq.f32.partialorder %v529_v29, 8.507059e+37  ;;  %v548_v36 = vsel %vm1408_vm15, %v547_v7, %v543_v3  ;;  %v636_v57 = vadd.s32 4294967184, %v981_v5  ;;  %v528_v1 = vsel %vm527_vm9, %v766_v43, %v524_v27 }
 0x158   :  { %v627_v0 = vsel %vm626_vm10, %v625_v52, %v623_v62  ;;  %vm630_vm14 = vcmask 851712   ;;  %v640_v8 = vadd.s32 4294967176, %v981_v5  ;;  %v533_v20 = vsel %vm530_vm12, %v532_v35, %v528_v1 }
 0x159   :  { %v563_v10 = vsel %vm1433_vm0, %v562_v46, %v558_v54  ;;  %v629_v25 = vperm.slane %v518_v4, %v628_v23  ;;  %vm634_vm13 = vcmask 917312   ;;  %v633_v9 = vperm.slane %v533_v20, %v632_v2 }
 0x15a   :  { %vm638_vm1 = vcmask 982912   ;;  %v637_v19 = vperm.slane %v548_v36, %v636_v57  ;;  %vm642_vm15 = vcmask 1048512   ;;  %v641_v26 = vperm.slane %v563_v10, %v640_v8 }
 0x15b   :  { %v631_v13 = vsel %vm630_vm14, %v629_v25, %v627_v0 }
 0x15c   :  { %v635_v21 = vsel %vm634_vm13, %v633_v9, %v631_v13 }
 0x15d   :  { %v639_v5 = vsel %vm638_vm1, %v637_v19, %v635_v21 }
 0x15e   :  { %v643_v53 = vsel %vm642_vm15, %v641_v26, %v639_v5 }
 0x15f   :  { %645 = vst [vmem:[#allocation3] sm:$0x1] %v643_v53 }
 0x160   :  { %656 = dma.vmem_to_hbm [thread:$0]  %s652_s4, 16, %s654_s8, [#allocation4]  }
 0x161   :  { %791 = dma.done.wait [#allocation4], 16  }
 0x162   :  { %792 = vsyncadd [#allocation4], 4294967280 }
 0x163   :  { %661 = vsyncpa [#allocation4], 1 }

</bundles_post_ra>
